<compile_context>
chip_gen: v7x
topology: tpu7x:2x2x1
jax: 0.10.0
libtpu: 0.0.40
codegen_flags: <defaults>
</compile_context>

<pallas_src>
import functools

import jax
import jax.numpy as jnp
from jax.experimental import pallas as pl
from jax.experimental.pallas import tpu as pltpu

_LANE = 128
_SUBLANE = 8


def _round_up(n, m):
    return ((n + m - 1) // m) * m


def _silu(v):
    return v * jax.nn.sigmoid(v)


def _elementwise_dtype():
    """bf16 VPU/EUP exist on v6e/v7x; v5e and earlier need f32 elementwise."""
    try:
        kind = jax.devices()[0].device_kind.lower()
    except Exception:
        return jnp.float32
    if any(old in kind for old in ("v2", "v3", "v4", "v5")):
        return jnp.float32
    return jnp.bfloat16


def intrinsic_kernel(
    x_ref, c_ref,
    wxe_ref, bxe_ref,          # x_encoder params (bf16 weight, f32 bias)
    wce_ref, bce_ref,          # condition_encoder params
    w1x_ref, w1c_ref, b1_ref,  # backbone layer 1 (w1 split row-wise)
    w2_ref, b2_ref,            # backbone layer 2 (output head)
    o_ref,
    *, ew_dtype,
):
    bf = jnp.bfloat16

    # Encoders: bf16 MXU matmul -> f32 accumulate (inputs arrive f32, cast here
    # so no padded / casted activation copy is ever materialized in HBM).
    hx = jnp.dot(x_ref[...].astype(bf), wxe_ref[...],
                 preferred_element_type=jnp.float32)
    hc = jnp.dot(c_ref[...].astype(bf), wce_ref[...],
                 preferred_element_type=jnp.float32)

    # Bias + SiLU in ew_dtype (bf16 on v6e/v7x, f32 on v5e), single cast back
    # to bf16 MXU operands.
    hx = _silu(hx.astype(ew_dtype) + bxe_ref[...].astype(ew_dtype)).astype(bf)
    hc = _silu(hc.astype(ew_dtype) + bce_ref[...].astype(ew_dtype)).astype(bf)

    # Backbone layer 1: concat([hx, hc]) @ w1 rewritten as two accumulated
    # matmuls on the row-split weight -> no XLU concat / extra VMEM buffer.
    h1 = (jnp.dot(hx, w1x_ref[...], preferred_element_type=jnp.float32)
          + jnp.dot(hc, w1c_ref[...], preferred_element_type=jnp.float32))
    h1 = _silu(h1.astype(ew_dtype) + b1_ref[...].astype(ew_dtype)).astype(bf)

    # Output head: f32 bias add on the accumulator, single cast on the bf16
    # store (halves output HBM traffic vs f32).
    out = jnp.dot(h1, w2_ref[...], preferred_element_type=jnp.float32)
    o_ref[...] = (out + b2_ref[...]).astype(o_ref.dtype)


def prepare_params(params):
    """One-time parameter padding / casting, hoisted out of the forward path.

    Hidden / output dims are zero-padded to multiples of 128 (lane-dense
    matmuls and an unmasked output store); x_dim / cond_dim stay at their true
    sizes so the activation streams are unpadded.  Zero padding guarantees the
    padded hidden/output columns stay exactly 0 through SiLU.
    """
    x_dim, hidden = params["wxe"].shape
    cond_dim = params["wce"].shape[0]
    out_dim = params["w2"].shape[1]
    pH = _round_up(hidden, _LANE)
    pDo = _round_up(out_dim, _LANE)

    def padw(w, rows, cols):
        w = w.astype(jnp.bfloat16)
        return jnp.pad(w, ((0, rows - w.shape[0]), (0, cols - w.shape[1])))

    def padb(b, cols):
        b = b.reshape(1, -1).astype(jnp.float32)
        return jnp.pad(b, ((0, 0), (0, cols - b.shape[1])))

    return {
        "x_dim": x_dim, "cond_dim": cond_dim,
        "hidden": hidden, "out_dim": out_dim, "pH": pH, "pDo": pDo,
        "wxe": padw(params["wxe"], x_dim, pH),
        "bxe": padb(params["bxe"], pH),
        "wce": padw(params["wce"], cond_dim, pH),
        "bce": padb(params["bce"], pH),
        # w1 split row-wise: top `hidden` rows multiply x_emb, rest c_emb.
        "w1x": padw(params["w1"][:hidden], pH, pH),
        "w1c": padw(params["w1"][hidden:], pH, pH),
        "b1": padb(params["b1"], pH),
        "w2": padw(params["w2"], pH, pDo),
        "b2": padb(params["b2"], pDo),
    }


def intrinsic_model_forward(x, condition, pparams, *, batch_tile=1024,
                            out_dtype=jnp.float32):
    """Batch-tiled pallas_call; weights stay VMEM-resident across grid steps."""
    B, x_dim = x.shape
    Bc, cond_dim = condition.shape
    assert B == Bc
    assert x_dim == pparams["x_dim"] and cond_dim == pparams["cond_dim"]
    pH, pDo, out_dim = pparams["pH"], pparams["pDo"], pparams["out_dim"]

    # Balanced batch tiling: >= 2 grid steps whenever B allows (keeps both v7x
    # TensorCores busy) and a nearly-full last tile.  VMEM at TB=1024 is only
    # a few MiB, well under every scoped limit; raise vmem_limit_bytes before
    # pushing batch_tile past ~2048 on v5e.
    n_steps = pl.cdiv(B, batch_tile)
    if B >= 2 * _SUBLANE:
        n_steps = max(n_steps, 2)
    TB = _round_up(pl.cdiv(B, n_steps), _SUBLANE)
    n_steps = pl.cdiv(B, TB)
    pB = TB * n_steps

    # Row padding only, and only when the batch is not tile-aligned.  Feature
    # dims are never padded, so there is no lane amplification on the
    # activation streams.
    if pB != B:
        x = jnp.pad(x, ((0, pB - B), (0, 0)))
        condition = jnp.pad(condition, ((0, pB - B), (0, 0)))

    args = (x, condition,
            pparams["wxe"], pparams["bxe"],
            pparams["wce"], pparams["bce"],
            pparams["w1x"], pparams["w1c"], pparams["b1"],
            pparams["w2"], pparams["b2"])

    # Per-grid-step activation / output tiles.
    def row_spec(d):
        return pl.BlockSpec((TB, d), lambda i: (i, 0))

    # Grid-invariant (VMEM-resident) parameter tiles.
    def const_spec(r, c):
        return pl.BlockSpec((r, c), lambda i: (0, 0))

    in_specs = [
        row_spec(x_dim), row_spec(cond_dim),
        const_spec(x_dim, pH), const_spec(1, pH),
        const_spec(cond_dim, pH), const_spec(1, pH),
        const_spec(pH, pH), const_spec(pH, pH), const_spec(1, pH),
        const_spec(pH, pDo), const_spec(1, pDo),
    ]

    flops = 2 * pB * (x_dim * pH + cond_dim * pH + 2 * pH * pH + pH * pDo)
    transcendentals = pB * 3 * pH  # one sigmoid per hidden activation
    bytes_accessed = (sum(int(a.size) * a.dtype.itemsize for a in args)
                      + pB * pDo * 2)  # bf16 output writeback

    kernel = functools.partial(intrinsic_kernel, ew_dtype=_elementwise_dtype())

    out_p = pl.pallas_call(
        kernel,
        out_shape=jax.ShapeDtypeStruct((pB, pDo), jnp.bfloat16),
        grid=(n_steps,),
        in_specs=in_specs,
        out_specs=row_spec(pDo),
        compiler_params=pltpu.CompilerParams(
            dimension_semantics=("parallel",)),
        cost_estimate=pl.CostEstimate(
            flops=flops,
            transcendentals=transcendentals,
            bytes_accessed=bytes_accessed),
    )(*args)

    return out_p[:B, :out_dim].astype(out_dtype)


def init_params(key, x_dim, cond_dim, hidden, out_dim):
    ks = jax.random.split(key, 8)
    scale = 0.1
    return {
        "wxe": scale * jax.random.normal(ks[0], (x_dim, hidden), jnp.float32),
        "bxe": scale * jax.random.normal(ks[1], (1, hidden), jnp.float32),
        "wce": scale * jax.random.normal(ks[2], (cond_dim, hidden), jnp.float32),
        "bce": scale * jax.random.normal(ks[3], (1, hidden), jnp.float32),
        "w1": scale * jax.random.normal(ks[4], (2 * hidden, hidden), jnp.float32),
        "b1": scale * jax.random.normal(ks[5], (1, hidden), jnp.float32),
        "w2": scale * jax.random.normal(ks[6], (hidden, out_dim), jnp.float32),
        "b2": scale * jax.random.normal(ks[7], (1, out_dim), jnp.float32),
    }


def reference_forward(x, condition, p, ew_dtype):
    """Pure-JAX reference mirroring the kernel's bf16-matmul / f32-accumulate
    path and its elementwise dtype (final output kept in f32)."""
    bf = jnp.bfloat16

    def mm(a, w):
        return jnp.dot(a.astype(bf), w.astype(bf),
                       preferred_element_type=jnp.float32)

    def act(acc, b):
        return _silu(acc.astype(ew_dtype) + b.astype(ew_dtype)).astype(bf)

    hidden = p["wxe"].shape[1]
    hx = act(mm(x, p["wxe"]), p["bxe"])
    hc = act(mm(condition, p["wce"]), p["bce"])
    h1 = act(mm(hx, p["w1"][:hidden]) + mm(hc, p["w1"][hidden:]), p["b1"])
    return mm(h1, p["w2"]) + p["b2"]


if __name__ == "__main__":
    key = jax.random.PRNGKey(0)
    k_x, k_c, k_p = jax.random.split(key, 3)

    B, X_DIM, COND_DIM, HIDDEN, OUT_DIM = 32, 32, 16, 32, 8

    x = jax.random.normal(k_x, (B, X_DIM), jnp.float32)
    condition = jax.random.normal(k_c, (B, COND_DIM), jnp.float32)
    params = init_params(k_p, X_DIM, COND_DIM, HIDDEN, OUT_DIM)

    # One-time parameter preparation (hoisted out of the per-call path).
    pparams = prepare_params(params)

    out = intrinsic_model_forward(x, condition, pparams)
    out = jax.block_until_ready(out)

    ref = reference_forward(x, condition, params, _elementwise_dtype())
    assert out.shape == (B, OUT_DIM)
    # Kernel output passes through bf16 on store; tolerance covers that.
    assert jnp.allclose(out.astype(jnp.float32), ref, atol=2e-2, rtol=2e-2), (
        float(jnp.max(jnp.abs(out.astype(jnp.float32) - ref))))

    print("KERNEL_OK")
</pallas_src>

<mosaic_0001>
module attributes {stable_mosaic.version = 11 : i64} {
  func.func @intrinsic_kernel(%arg0: i32, %arg1: memref<16x32xf32, #tpu.memory_space<vmem>>, %arg2: memref<16x16xf32, #tpu.memory_space<vmem>>, %arg3: memref<32x128xbf16, #tpu.memory_space<vmem>>, %arg4: memref<1x128xf32, #tpu.memory_space<vmem>>, %arg5: memref<16x128xbf16, #tpu.memory_space<vmem>>, %arg6: memref<1x128xf32, #tpu.memory_space<vmem>>, %arg7: memref<128x128xbf16, #tpu.memory_space<vmem>>, %arg8: memref<128x128xbf16, #tpu.memory_space<vmem>>, %arg9: memref<1x128xf32, #tpu.memory_space<vmem>>, %arg10: memref<128x128xbf16, #tpu.memory_space<vmem>>, %arg11: memref<1x128xf32, #tpu.memory_space<vmem>>, %arg12: memref<16x128xbf16, #tpu.memory_space<vmem>>) attributes {dimension_semantics = [#tpu.dimension_semantics<parallel>], iteration_bounds = array<i64: 2>, scalar_prefetch = 0 : i64, scratch_operands = 0 : i64, tpu.core_type = #tpu.core_type<tc>, window_params = [{transform_indices = @transform_0, window_bounds = array<i64: 16, 32>}, {transform_indices = @transform_1, window_bounds = array<i64: 16, 16>}, {pipeline_mode = #tpu.pipeline_mode<synchronous>, transform_indices = @transform_2, window_bounds = array<i64: 32, 128>}, {pipeline_mode = #tpu.pipeline_mode<synchronous>, transform_indices = @transform_3, window_bounds = array<i64: 1, 128>}, {pipeline_mode = #tpu.pipeline_mode<synchronous>, transform_indices = @transform_4, window_bounds = array<i64: 16, 128>}, {pipeline_mode = #tpu.pipeline_mode<synchronous>, transform_indices = @transform_5, window_bounds = array<i64: 1, 128>}, {pipeline_mode = #tpu.pipeline_mode<synchronous>, transform_indices = @transform_6, window_bounds = array<i64: 128, 128>}, {pipeline_mode = #tpu.pipeline_mode<synchronous>, transform_indices = @transform_7, window_bounds = array<i64: 128, 128>}, {pipeline_mode = #tpu.pipeline_mode<synchronous>, transform_indices = @transform_8, window_bounds = array<i64: 1, 128>}, {pipeline_mode = #tpu.pipeline_mode<synchronous>, transform_indices = @transform_9, window_bounds = array<i64: 128, 128>}, {pipeline_mode = #tpu.pipeline_mode<synchronous>, transform_indices = @transform_10, window_bounds = array<i64: 1, 128>}, {transform_indices = @transform_11, window_bounds = array<i64: 16, 128>}]} {
    %c0 = arith.constant 0 : index
    %c0_0 = arith.constant 0 : index
    %0 = vector.load %arg1[%c0, %c0_0] : memref<16x32xf32, #tpu.memory_space<vmem>>, vector<16x32xf32>
    %1 = arith.truncf %0 : vector<16x32xf32> to vector<16x32xbf16>
    %c0_1 = arith.constant 0 : index
    %c0_2 = arith.constant 0 : index
    %2 = vector.load %arg3[%c0_1, %c0_2] : memref<32x128xbf16, #tpu.memory_space<vmem>>, vector<32x128xbf16>
    %cst = arith.constant dense<0.000000e+00> : vector<16x128xf32>
    %3 = tpu.matmul %1, %2, %cst {dimension_numbers = #tpu.dot_dimension_numbers<[1], [0], [0], [1], [0, 0, 1, 1], [], []>} : vector<16x32xbf16>, vector<32x128xbf16>, vector<16x128xf32> -> vector<16x128xf32>
    %c0_3 = arith.constant 0 : index
    %c0_4 = arith.constant 0 : index
    %4 = vector.load %arg2[%c0_3, %c0_4] : memref<16x16xf32, #tpu.memory_space<vmem>>, vector<16x16xf32>
    %5 = arith.truncf %4 : vector<16x16xf32> to vector<16x16xbf16>
    %c0_5 = arith.constant 0 : index
    %c0_6 = arith.constant 0 : index
    %6 = vector.load %arg5[%c0_5, %c0_6] : memref<16x128xbf16, #tpu.memory_space<vmem>>, vector<16x128xbf16>
    %cst_7 = arith.constant dense<0.000000e+00> : vector<16x128xf32>
    %7 = tpu.matmul %5, %6, %cst_7 {dimension_numbers = #tpu.dot_dimension_numbers<[1], [0], [0], [1], [0, 0, 1, 1], [], []>} : vector<16x16xbf16>, vector<16x128xbf16>, vector<16x128xf32> -> vector<16x128xf32>
    %8 = arith.truncf %3 : vector<16x128xf32> to vector<16x128xbf16>
    %c0_8 = arith.constant 0 : index
    %c0_9 = arith.constant 0 : index
    %9 = vector.load %arg4[%c0_8, %c0_9] : memref<1x128xf32, #tpu.memory_space<vmem>>, vector<1x128xf32>
    %10 = arith.truncf %9 : vector<1x128xf32> to vector<1x128xbf16>
    %11 = vector.broadcast %10 : vector<1x128xbf16> to vector<16x128xbf16>
    %12 = arith.addf %8, %11 : vector<16x128xbf16>
    %13 = arith.negf %12 : vector<16x128xbf16>
    %14 = math.exp %13 : vector<16x128xbf16>
    %cst_10 = arith.constant 1.000000e+00 : bf16
    %15 = vector.broadcast %cst_10 : bf16 to vector<16x128xbf16>
    %16 = arith.addf %15, %14 : vector<16x128xbf16>
    %17 = arith.divf %15, %16 : vector<16x128xbf16>
    %18 = arith.mulf %12, %17 : vector<16x128xbf16>
    %19 = arith.truncf %7 : vector<16x128xf32> to vector<16x128xbf16>
    %c0_11 = arith.constant 0 : index
    %c0_12 = arith.constant 0 : index
    %20 = vector.load %arg6[%c0_11, %c0_12] : memref<1x128xf32, #tpu.memory_space<vmem>>, vector<1x128xf32>
    %21 = arith.truncf %20 : vector<1x128xf32> to vector<1x128xbf16>
    %22 = vector.broadcast %21 : vector<1x128xbf16> to vector<16x128xbf16>
    %23 = arith.addf %19, %22 : vector<16x128xbf16>
    %24 = arith.negf %23 : vector<16x128xbf16>
    %25 = math.exp %24 : vector<16x128xbf16>
    %cst_13 = arith.constant 1.000000e+00 : bf16
    %26 = vector.broadcast %cst_13 : bf16 to vector<16x128xbf16>
    %27 = arith.addf %26, %25 : vector<16x128xbf16>
    %28 = arith.divf %26, %27 : vector<16x128xbf16>
    %29 = arith.mulf %23, %28 : vector<16x128xbf16>
    %c0_14 = arith.constant 0 : index
    %c0_15 = arith.constant 0 : index
    %30 = vector.load %arg7[%c0_14, %c0_15] : memref<128x128xbf16, #tpu.memory_space<vmem>>, vector<128x128xbf16>
    %cst_16 = arith.constant dense<0.000000e+00> : vector<16x128xf32>
    %31 = tpu.matmul %18, %30, %cst_16 {dimension_numbers = #tpu.dot_dimension_numbers<[1], [0], [0], [1], [0, 0, 1, 1], [], []>} : vector<16x128xbf16>, vector<128x128xbf16>, vector<16x128xf32> -> vector<16x128xf32>
    %c0_17 = arith.constant 0 : index
    %c0_18 = arith.constant 0 : index
    %32 = vector.load %arg8[%c0_17, %c0_18] : memref<128x128xbf16, #tpu.memory_space<vmem>>, vector<128x128xbf16>
    %cst_19 = arith.constant dense<0.000000e+00> : vector<16x128xf32>
    %33 = tpu.matmul %29, %32, %cst_19 {dimension_numbers = #tpu.dot_dimension_numbers<[1], [0], [0], [1], [0, 0, 1, 1], [], []>} : vector<16x128xbf16>, vector<128x128xbf16>, vector<16x128xf32> -> vector<16x128xf32>
    %34 = arith.addf %31, %33 : vector<16x128xf32>
    %35 = arith.truncf %34 : vector<16x128xf32> to vector<16x128xbf16>
    %c0_20 = arith.constant 0 : index
    %c0_21 = arith.constant 0 : index
    %36 = vector.load %arg9[%c0_20, %c0_21] : memref<1x128xf32, #tpu.memory_space<vmem>>, vector<1x128xf32>
    %37 = arith.truncf %36 : vector<1x128xf32> to vector<1x128xbf16>
    %38 = vector.broadcast %37 : vector<1x128xbf16> to vector<16x128xbf16>
    %39 = arith.addf %35, %38 : vector<16x128xbf16>
    %40 = arith.negf %39 : vector<16x128xbf16>
    %41 = math.exp %40 : vector<16x128xbf16>
    %cst_22 = arith.constant 1.000000e+00 : bf16
    %42 = vector.broadcast %cst_22 : bf16 to vector<16x128xbf16>
    %43 = arith.addf %42, %41 : vector<16x128xbf16>
    %44 = arith.divf %42, %43 : vector<16x128xbf16>
    %45 = arith.mulf %39, %44 : vector<16x128xbf16>
    %c0_23 = arith.constant 0 : index
    %c0_24 = arith.constant 0 : index
    %46 = vector.load %arg10[%c0_23, %c0_24] : memref<128x128xbf16, #tpu.memory_space<vmem>>, vector<128x128xbf16>
    %cst_25 = arith.constant dense<0.000000e+00> : vector<16x128xf32>
    %47 = tpu.matmul %45, %46, %cst_25 {dimension_numbers = #tpu.dot_dimension_numbers<[1], [0], [0], [1], [0, 0, 1, 1], [], []>} : vector<16x128xbf16>, vector<128x128xbf16>, vector<16x128xf32> -> vector<16x128xf32>
    %c0_26 = arith.constant 0 : index
    %c0_27 = arith.constant 0 : index
    %48 = vector.load %arg11[%c0_26, %c0_27] : memref<1x128xf32, #tpu.memory_space<vmem>>, vector<1x128xf32>
    %49 = vector.broadcast %48 : vector<1x128xf32> to vector<16x128xf32>
    %50 = arith.addf %47, %49 : vector<16x128xf32>
    %51 = arith.truncf %50 : vector<16x128xf32> to vector<16x128xbf16>
    %c0_28 = arith.constant 0 : index
    %c0_29 = arith.constant 0 : index
    %52 = vector.load %arg12[%c0_28, %c0_29] : memref<16x128xbf16, #tpu.memory_space<vmem>>, vector<16x128xbf16>
    tpu.vector_store %arg12[%c0_28, %c0_29], %51 {strides = array<i32>} : memref<16x128xbf16, #tpu.memory_space<vmem>>, vector<16x128xbf16>,
    return
  }
  func.func @transform_0(%arg0: i32) -> (i32, i32) {
    %c0_i32 = arith.constant 0 : i32
    %c0_i32_0 = arith.constant 0 : i32
    return %arg0, %c0_i32 : i32, i32
  }
  func.func @transform_1(%arg0: i32) -> (i32, i32) {
    %c0_i32 = arith.constant 0 : i32
    %c0_i32_0 = arith.constant 0 : i32
    return %arg0, %c0_i32 : i32, i32
  }
  func.func @transform_2(%arg0: i32) -> (i32, i32) {
    %c0_i32 = arith.constant 0 : i32
    %c0_i32_0 = arith.constant 0 : i32
    %c0_i32_1 = arith.constant 0 : i32
    return %c0_i32, %c0_i32_0 : i32, i32
  }
  func.func @transform_3(%arg0: i32) -> (i32, i32) {
    %c0_i32 = arith.constant 0 : i32
    %c0_i32_0 = arith.constant 0 : i32
    %c0_i32_1 = arith.constant 0 : i32
    return %c0_i32, %c0_i32_0 : i32, i32
  }
  func.func @transform_4(%arg0: i32) -> (i32, i32) {
    %c0_i32 = arith.constant 0 : i32
    %c0_i32_0 = arith.constant 0 : i32
    %c0_i32_1 = arith.constant 0 : i32
    return %c0_i32, %c0_i32_0 : i32, i32
  }
  func.func @transform_5(%arg0: i32) -> (i32, i32) {
    %c0_i32 = arith.constant 0 : i32
    %c0_i32_0 = arith.constant 0 : i32
    %c0_i32_1 = arith.constant 0 : i32
    return %c0_i32, %c0_i32_0 : i32, i32
  }
  func.func @transform_6(%arg0: i32) -> (i32, i32) {
    %c0_i32 = arith.constant 0 : i32
    %c0_i32_0 = arith.constant 0 : i32
    %c0_i32_1 = arith.constant 0 : i32
    return %c0_i32, %c0_i32_0 : i32, i32
  }
  func.func @transform_7(%arg0: i32) -> (i32, i32) {
    %c0_i32 = arith.constant 0 : i32
    %c0_i32_0 = arith.constant 0 : i32
    %c0_i32_1 = arith.constant 0 : i32
    return %c0_i32, %c0_i32_0 : i32, i32
  }
  func.func @transform_8(%arg0: i32) -> (i32, i32) {
    %c0_i32 = arith.constant 0 : i32
    %c0_i32_0 = arith.constant 0 : i32
    %c0_i32_1 = arith.constant 0 : i32
    return %c0_i32, %c0_i32_0 : i32, i32
  }
  func.func @transform_9(%arg0: i32) -> (i32, i32) {
    %c0_i32 = arith.constant 0 : i32
    %c0_i32_0 = arith.constant 0 : i32
    %c0_i32_1 = arith.constant 0 : i32
    return %c0_i32, %c0_i32_0 : i32, i32
  }
  func.func @transform_10(%arg0: i32) -> (i32, i32) {
    %c0_i32 = arith.constant 0 : i32
    %c0_i32_0 = arith.constant 0 : i32
    %c0_i32_1 = arith.constant 0 : i32
    return %c0_i32, %c0_i32_0 : i32, i32
  }
  func.func @transform_11(%arg0: i32) -> (i32, i32) {
    %c0_i32 = arith.constant 0 : i32
    %c0_i32_0 = arith.constant 0 : i32
    return %arg0, %c0_i32 : i32, i32
  }
}

</mosaic_0001>

<bundles_post_ra>
// kernel: tpu_custom_call.1
= control target key start
LH: loop header
LB: loop body
LE: loop exit
PB: predicated region body
PF: predicated region fallthrough
CT: control target
= control target key end

     0   :  { %s2111_s0 = inlined_call_operand.hbm [shape: f32[32,32], index: 0, kind: input, shape index: {}]   ;;  %s2112_s1 = inlined_call_operand.vmem [shape: f32[32,16], index: 1, kind: input, shape index: {}]   ;;  %s2113_s2 = inlined_call_operand.hbm [shape: bf16[32,128], index: 2, kind: input, shape index: {}]   ;;  %s2114_s3 = inlined_call_operand.vmem [shape: f32[1,128], index: 3, kind: input, shape index: {}]   ;;  %s2115_s4 = inlined_call_operand.hbm [shape: bf16[16,128], index: 4, kind: input, shape index: {}]   ;;  %s2116_s5 = inlined_call_operand.vmem [shape: f32[1,128], index: 5, kind: input, shape index: {}]   ;;  %s2117_s6 = inlined_call_operand.vmem [shape: bf16[128,128], index: 6, kind: input, shape index: {}]   ;;  %s2118_s7 = inlined_call_operand.hbm [shape: bf16[128,128], index: 7, kind: input, shape index: {}]   ;;  %s2119_s8 = inlined_call_operand.vmem [shape: f32[1,128], index: 8, kind: input, shape index: {}]   ;;  %s2120_s9 = inlined_call_operand.hbm [shape: bf16[128,128], index: 9, kind: input, shape index: {}]   ;;  %s2121_s10 = inlined_call_operand.vmem [shape: f32[1,128], index: 10, kind: input, shape index: {}]   ;;  %s2122_s11 = inlined_call_operand.hbm [shape: bf16[32,128], index: 11, kind: output, shape index: {}]  }
   0x1   :  { %2129 = sst [smem:[#allocation18_spill]] %s2119_s8 }
   0x2   :  { %2130 = sst [smem:[#allocation19_spill]] %s2121_s10 }
   0x3   :  { %2131 = sst [smem:[#allocation20_spill]] %s2122_s11 }
   0x4   :  { %16 = vsyncpa [#allocation3], 0 }
   0x5   :  { %18 = vsyncpa [#allocation3 + $0x1], 0 }
   0x6   :  { %19 = vsyncpa [#allocation6], 0 }
   0x7   :  { %20 = vsyncpa [#allocation9], 0 }
   0x8   :  { %21 = vsyncpa [#allocation4], 0 }
   0x9   :  { %23 = vsyncpa [#allocation4 + $0x1], 0  ;;  %s1739_s17 = smov 0   ;;  %s1741_s18 = smov 0  }
   0xa   :  { %s1743_s19 = smov 0   ;;  %s1745_s20 = smov 0  }
   0xb LB: > { %2132 = sst [smem:[#allocation16_spill]] %s1651_s17  ;;  %s1760_s21 = sadd.s32 4294967295, %s1663_s20   ;;  %s1663_s20 = sphi %s1745_s20, %s2158_s20   ;;  %s1659_s19 = sphi %s1743_s19, %s2157_s19   ;;  %s1655_s18 = sphi %s1741_s18, %s2156_s18   ;;  %s1651_s17 = sphi %s1739_s17, %s2155_s17  }
   0xc   : > { %s1135_s22 = sadd.s32 4294967294, %s1663_s20   ;;  %p49_p0 = scmp.ne.s32.totalorder %s1655_s18, %s1651_s17 }
   0xd   : > { %p2124_p1 = scmp.eq.s32.totalorder %s1760_s21, 0  ;;  %p294_p3 = scmp.eq.s32.totalorder %s1135_s22, 1 }
   0xe   : > { %p1136_p5 = scmp.ge.s32.totalorder %s1663_s20, 1  ;;  %p301_p7 = scmp.lt.s32.totalorder %s1663_s20, 3 }
   0xf   : > { %p1769_p4 = por %p2124_p1, %p49_p0  ;;  %p1774_p6 = por %p294_p3, %p49_p0 }
  0x10   : > { %p1779_p8 = pnand %p1136_p5, %p301_p7  ;;  %s1665_s26 = smov [#allocation5]  }
  0x11   : > { %s2133_s23 = scalar_select %p1769_p4, 1, 0 }
  0x12   : > { %s2134_s24 = scalar_select %p1774_p6, 1, 0 }
  0x13   : > { %s2136_s25 = scalar_select %p1779_p8, 1, 0 }
  0x14   : > { %2135 = sst [smem:[#allocation17_spill]] %s2134_s24  ;;  %s313_s27 = sshll.u32 %s1665_s26, 4  ;;  %s1783_s27 = int_to_ptr.vmem [resolvable:$true] %s313_s27 }
  0x15   : > { %p1333_p9 = pneg %p1779_p8  ;;  %s1666_s29 = smov [#allocation8]  }
  0x16   : > { %s348_s30 = sshll.u32 %s1666_s29, 4  ;;  %s1667_s12 = smov [#allocation7]   ;;  %s1794_s30 = int_to_ptr.vmem [resolvable:$true] %s348_s30 }
  0x17   : > { %p1790_p11 = pnand %p1333_p9, %p2124_p1  ;;  %s1796_s13 = sshll.u32 %s1667_s12, 4  ;;  %s330_s13 = int_to_ptr.vmem [resolvable:$true] %s1796_s13 }
  0x18   : > { %s1447_s16 = scalar_lea.hbm %s2113_s2, 256 }
  0x19   : > { %p1448_p12 = scmp.ne.s32.totalorder %s2113_s2, %s1447_s16  ;;  %p1806_p13 = pneg %p1790_p11 }
  0x1a   : > { %p1454_p5 = scmp.lt.u32.totalorder %s1447_s16, %s2113_s2 }
  0x1b   : > { %p1450_p0 = pnand %p1806_p13, %p1448_p12 }
  0x1d   : > { %p1451_p3 = pneg %p1450_p0 }
  0x1f   : > { %p1456_p7 = pnand %p1454_p5, %p1451_p3 }
  0x21   : > { %1459 = shalt.err (!%p1456_p7)
}
  0x22   : > { %s1460_s14 = scalar_lea.vmem %s1783_s27, 256  ;;  %p1468_p2 = scmp.lt.s32.totalorder %s1783_s27, %s1783_s27 }
  0x23   : > { %p1461_p9 = scmp.ne.s32.totalorder %s1783_s27, %s1460_s14  ;;  %p1469_p6 = scmp.lt.s32.totalorder %s1460_s14, %s1460_s14 }
  0x25   : > { %p1463_p10 = pnand %p1461_p9, %p1806_p13  ;;  %p1470_p12 = por %p1469_p6, %p1468_p2 }
  0x27   : > { %p1464_p1 = pneg %p1463_p10 }
  0x29   : > { %p1471_p0 = pnand %p1470_p12, %p1464_p1 }
  0x2b   : > { %1474 = shalt.err (!%p1471_p0)
}
  0x2c   : > { %s1668_s15 = smov 64   ;;  %s1669_s16 = smov 4  }
  0x2d   : > { %1336 = dma.hbm_to_vmem [thread:$0]  (!%p1790_p11), %s2113_s2, 256, %s1783_s27, [#allocation6], %s1668_s15, %s1668_s15, %s1669_s16  }
  0x2e   : > { %s1475_s14 = scalar_lea.hbm %s2118_s7, 1024 }
  0x2f   : > { %p1476_p1 = scmp.ne.s32.totalorder %s2118_s7, %s1475_s14  ;;  %p1482_p10 = scmp.lt.u32.totalorder %s1475_s14, %s2118_s7 }
  0x31   : > { %p1478_p2 = pnand %p1476_p1, %p1806_p13 }
  0x33   : > { %p1479_p6 = pneg %p1478_p2 }
  0x35   : > { %p1484_p3 = pnand %p1482_p10, %p1479_p6 }
  0x37   : > { %1487 = shalt.err (!%p1484_p3)
}
  0x38   : > { %s1488_s27 = scalar_lea.vmem %s1794_s30, 1024  ;;  %p1496_p12 = scmp.lt.s32.totalorder %s1794_s30, %s1794_s30 }
  0x39   : > { %p1489_p5 = scmp.ne.s32.totalorder %s1794_s30, %s1488_s27  ;;  %p1497_p0 = scmp.lt.s32.totalorder %s1488_s27, %s1488_s27 }
  0x3b   : > { %p1491_p7 = pnand %p1489_p5, %p1806_p13  ;;  %p1498_p1 = por %p1497_p0, %p1496_p12 }
  0x3d   : > { %p1492_p9 = pneg %p1491_p7 }
  0x3f   : > { %p1499_p2 = pnand %p1498_p1, %p1492_p9 }
  0x41   : > { %1502 = shalt.err (!%p1499_p2)
}
  0x42   : > { %1342 = dma.hbm_to_vmem [thread:$0]  (!%p1790_p11), %s2118_s7, 1024, %s1794_s30, [#allocation9], %s1668_s15, %s1668_s15, %s1669_s16  }
  0x43   : > { %s1503_s22 = scalar_lea.hbm %s2115_s4, 128 }
  0x44   : > { %p1504_p6 = scmp.ne.s32.totalorder %s2115_s4, %s1503_s22  ;;  %p1510_p5 = scmp.lt.u32.totalorder %s1503_s22, %s2115_s4 }
  0x46   : > { %p1506_p10 = pnand %p1504_p6, %p1806_p13 }
  0x48   : > { %p1507_p3 = pneg %p1506_p10 }
  0x4a   : > { %p1512_p7 = pnand %p1510_p5, %p1507_p3 }
  0x4c   : > { %1515 = shalt.err (!%p1512_p7)
}
  0x4d   : > { %s1516_s27 = scalar_lea.vmem %s330_s13, 128  ;;  %p1524_p1 = scmp.lt.s32.totalorder %s330_s13, %s330_s13 }
  0x4e   : > { %p1517_p9 = scmp.ne.s32.totalorder %s330_s13, %s1516_s27  ;;  %p1525_p2 = scmp.lt.s32.totalorder %s1516_s27, %s1516_s27 }
  0x50   : > { %p1519_p12 = pnand %p1517_p9, %p1806_p13  ;;  %p1526_p4 = por %p1525_p2, %p1524_p1 }
  0x52   : > { %p1520_p0 = pneg %p1519_p12 }
  0x54   : > { %p1527_p8 = pnand %p1526_p4, %p1520_p0 }
  0x56   : > { %1530 = shalt.err (!%p1527_p8)
}
  0x57   : > { %1339 = dma.hbm_to_vmem [thread:$0]  (!%p1790_p11), %s2115_s4, 128, %s330_s13, [#allocation6], %s1668_s15, %s1668_s15, %s1669_s16  }
  0x58   : > { %s1670_s10 = smov [#allocation10]   ;;  %s1531_s26 = scalar_lea.hbm %s2120_s9, 1024 }
  0x59   : > { %s364_s11 = sshll.u32 %s1670_s10, 4  ;;  %p1532_p4 = scmp.ne.s32.totalorder %s2120_s9, %s1531_s26  ;;  %s365_s11 = int_to_ptr.vmem [resolvable:$true] %s364_s11 }
  0x5a   : > { %p1538_p10 = scmp.lt.u32.totalorder %s1531_s26, %s2120_s9 }
  0x5b   : > { %p1534_p8 = pnand %p1532_p4, %p1806_p13 }
  0x5d   : > { %p1535_p6 = pneg %p1534_p8 }
  0x5f   : > { %p1540_p3 = pnand %p1538_p10, %p1535_p6 }
  0x61   : > { %1543 = shalt.err (!%p1540_p3)
}
  0x62   : > { %s1544_s13 = scalar_lea.vmem %s365_s11, 1024  ;;  %p1552_p12 = scmp.lt.s32.totalorder %s365_s11, %s365_s11 }
  0x63   : > { %p1545_p5 = scmp.ne.s32.totalorder %s365_s11, %s1544_s13  ;;  %p1553_p0 = scmp.lt.s32.totalorder %s1544_s13, %s1544_s13 }
  0x65   : > { %p1547_p7 = pnand %p1545_p5, %p1806_p13  ;;  %p1554_p1 = por %p1553_p0, %p1552_p12 }
  0x67   : > { %p1548_p9 = pneg %p1547_p7 }
  0x69   : > { %p1555_p2 = pnand %p1554_p1, %p1548_p9 }
  0x6b   : > { %1558 = shalt.err (!%p1555_p2)
}
  0x6c   : > { %1345 = dma.hbm_to_vmem [thread:$0]  (!%p1790_p11), %s2120_s9, 1024, %s365_s11, [#allocation9], %s1668_s15, %s1668_s15, %s1669_s16  }
  0x6d   : > { %s1900_s24 = sadd.s32 1, %s1663_s20   ;;  %s36_s28 = sadd.s32 1, %s1659_s19 }
  0x6e   : > { %s33_s10 = ssub.s32 %s1663_s20, %s1900_s24  ;;  %p43_p13 = scmp.ne.s32.totalorder %s1659_s19, %s1655_s18 }
  0x6f   : > { %p34_p4 = scmp.eq.s32.totalorder %s33_s10, 0  ;;  %p44_p8 = scmp.eq.s32.totalorder %s1663_s20, 0 }
  0x70   : > { %p2139_p6 = scmp.eq.s32.totalorder %s1760_s21, 1  ;;  %p1358_p3 = scmp.lt.s32.totalorder %s1663_s20, 2 }
  0x71   : > { %s1916_s22 = scalar_select %p34_p4, %s1659_s19, %s36_s28  }
  0x72   : > { %p1910_p10 = por %p2139_p6, %p43_p13  ;;  %p45_p5 = por %p44_p8, %p43_p13 }
  0x73   : > { %s381_s26 = sand.u32 1, %s1659_s19   ;;  %s1194_s15 = sshll.u32 %s1663_s20, 8 }
  0x74   : > { %s1142_s29 = sshll.u32 %s381_s26, 4  ;;  %s1923_s12 = scalar_lea.hbm %s2111_s0, %s1194_s15 }
  0x75   : > { %s385_s14 = scalar_lea.vmem [#allocation2], %s1142_s29  ;;  %p1927_p11 = pnand %p1358_p3, %p45_p5 }
  0x76   : > { %s392_s27 = sshll.u32 %s385_s14, 4  ;;  %s1931_s30 = scalar_lea.sflag [#allocation3], %s381_s26  ;;  %s1925_s27 = int_to_ptr.vmem [resolvable:$true] %s392_s27 }
  0x77   : > { %s1559_s8 = scalar_lea.hbm %s1923_s12, 256  ;;  %p1561_p9 = pneg %p1927_p11 }
  0x78   : > { %p1560_p7 = scmp.ne.s32.totalorder %s1923_s12, %s1559_s8  ;;  %s1564_s29 = scalar_lea.hbm %s2111_s0, 512 }
  0x79   : > { %p1565_p1 = scmp.lt.u32.totalorder %s1923_s12, %s2111_s0  ;;  %p1566_p2 = scmp.lt.u32.totalorder %s1564_s29, %s1559_s8 }
  0x7a   : > { %p1562_p12 = pnand %p1561_p9, %p1560_p7  ;;  %p1568_p4 = scmp.lt.u32.totalorder %s1559_s8, %s1923_s12 }
  0x7b   : > { %p1567_p13 = por %p1566_p2, %p1565_p1 }
  0x7c   : > { %p1563_p0 = pneg %p1562_p12 }
  0x7d   : > { %p1569_p8 = por %p1568_p4, %p1567_p13 }
  0x7f   : > { %p1570_p6 = pnand %p1569_p8, %p1563_p0 }
  0x81   : > { %1573 = shalt.err (!%p1570_p6)
}
  0x82   : > { %s1574_s26 = scalar_lea.vmem %s1925_s27, 256  ;;  %s1671_s11 = smov [#allocation2]  }
  0x83   : > { %p1575_p3 = scmp.ne.s32.totalorder %s1925_s27, %s1574_s26  ;;  %s1579_s14 = sshll.u32 %s1671_s11, 4  ;;  %s1580_s14 = int_to_ptr.vmem [resolvable:$false] %s1579_s14 }
  0x84   : > { %s1581_s28 = scalar_lea.vmem %s1580_s14, 512  ;;  %p1582_p12 = scmp.lt.s32.totalorder %s1925_s27, %s1580_s14 }
  0x85   : > { %p1577_p5 = pnand %p1575_p3, %p1561_p9  ;;  %p1583_p1 = scmp.lt.s32.totalorder %s1581_s28, %s1574_s26 }
  0x87   : > { %p1578_p7 = pneg %p1577_p5  ;;  %p1584_p2 = por %p1583_p1, %p1582_p12 }
  0x89   : > { %p1585_p13 = pnand %p1584_p2, %p1578_p7 }
  0x8b   : > { %1588 = shalt.err (!%p1585_p13)
}
  0x8c   : > { %s1672_s8 = smov 128   ;;  %s1673_s10 = smov 8  }
  0x8d   : > { %1349 = dma.hbm_to_vmem [thread:$0]  (!%p1927_p11), %s1923_s12, 256, %s1925_s27, %s1931_s30, %s1672_s8, %s1672_s8, %s1673_s10  }
  0x8e   : > { %p2142_p9 = scmp.ne.s32.totalorder %s2136_s25, 0 }
  0x8f   : > { %s1962_s29 = sand.u32 (!%p2142_p9), 1, %s1655_s18   ;;  %p2143_p0 = scmp.ne.s32.totalorder (!%p2142_p9), %s2133_s23, 0 }
  0x90   : > { %413 = sbr.rel (%p2142_p9) target bundleno = 941 (0x3ad), region = 64  ;;  %s1146_s15 = sshll.u32 (!%p2142_p9), %s1962_s29, 4 }
  0x91   : > { %s416_s16 = scalar_lea.sflag (!%p2142_p9), [#allocation3], %s1962_s29  ;;  %s419_s26 = scalar_lea.vmem (!%p2142_p9), [#allocation2], %s1146_s15 }
  0x97   : > { %1634 = dma.done.wait (%p2143_p0), %s416_s16, 256  }
  0x98   : > { %1636 = vsyncadd (%p2143_p0), %s416_s16, 4294967040  ;;  %p2144_p4 = scmp.eq.s32.totalorder %s1760_s21, 0 }
  0x9a   : > { %1638 = dma.done.wait (%p2144_p4), [#allocation6], 384   ;;  %p2145_p11 = pmov %p2144_p4 }
  0x9b   : > { %p2146_p8 = pmov %p2144_p4 }
  0x9c   : > { %1640 = vsyncadd (%p2145_p11), [#allocation6], 4294966912 }
  0x9d   : > { %1642 = dma.done.wait (%p2146_p8), [#allocation9], 2048   ;;  %p2147_p6 = pmov %p2144_p4 }
  0x9e   : > { %s1152_s25 = sshll.u32 %s1760_s21, 1  ;;  %v1674_v0 = vmov 0.0   ;;  %vm1675_vm0 = vmmov 0   ;;  %v1408_v1 = vld [vmem:[#allocation5] sm:$0xff]   ;;  %v1409_v2 = vld [vmem:[#allocation5 + $0x8] sm:$0xff]   ;;  %vm508_vm1 = vcmask 261120   ;;  %v615_v19 = vlaneseq }
  0x9f   : > { %1644 = vsyncadd (%p2147_p6), [#allocation9], 4294965248  ;;  %1235 = vmatprep.subr.bf16.mxu0 %v1674_v0  ;;  %1239 = vmatprep.mubr.msk.bf16.mxu0 %vm1675_vm0, %v1674_v0  ;;  %p481_p3 = scmp.lt.s32.totalorder %s1152_s25, 3  ;;  %v489_v3 = vld [vmem:[%s419_s26] sm:$0xff]  ;;  %v490_v4 = vld [vmem:[%s419_s26 + $0x8] sm:$0xff]  ;;  %vm564_vm2 = vcmask 130048  }
  0xa0   : > { %1249 = vmatprep.subr.bf16.mxu1 %v1674_v0  ;;  %1265 = vmatprep.mubr.msk.bf16.mxu1 %vm1675_vm0, %v1674_v0  ;;  %v1410_v5 = vld [vmem:[#allocation7] sm:$0xff]   ;;  %v491_v6 = vpack.c.bf16 %v490_v4, %v489_v3  ;;  %v1411_v10 = vld [vmem:[#allocation8] sm:$0xff]   ;;  %v1412_v11 = vld [vmem:[#allocation8 + $0x8] sm:$0xff]   ;;  %v616_v25 = vshrl.u32 %v615_v19, 7  ;;  %s2148_s26 = sld [smem:[#allocation18_spill]]  ;;  %s2149_s27 = sld [smem:[#allocation19_spill]] }
  0xa1   : > { %s2160_s25 = smov (!%p481_p3, %s1152_s25), 3  ;;  %1236 = vmatpush3.bf16.msra.mxu0 %v1408_v1  ;;  %1250 = vmatpush3.bf16.msra.mxu1 %v1411_v10  ;;  %v1413_v12 = vld [vmem:[#allocation8 + $0x10] sm:$0xff]   ;;  %v1414_v13 = vld [vmem:[#allocation8 + $0x18] sm:$0xff]   ;;  %v1415_v14 = vld [vmem:[#allocation8 + $0x20] sm:$0xff]   ;;  %s1197_s11 = sshll.u32 %s1760_s21, 7 }
  0xa2   : > { %s1153_s23 = sshll.u32 %s2160_s25, 3  ;;  %1237 = vmatprep.subr.bf16.mxu0 %v1674_v0  ;;  %1251 = vmatprep.subr.bf16.mxu1 %v1674_v0  ;;  %v1416_v15 = vld [vmem:[#allocation8 + $0x28] sm:$0xff]   ;;  %v1417_v16 = vld [vmem:[#allocation8 + $0x30] sm:$0xff]   ;;  %v1418_v17 = vld [vmem:[#allocation8 + $0x38] sm:$0xff]   ;;  %v2006_v28 = vsub.s32 0, %v616_v25  ;;  %s1151_s25 = sshll.u32 %s1962_s29, 3 }
  0xa3   : > { %s484_s13 = scalar_lea.vmem %s2112_s1, %s1153_s23  ;;  %v629_v18 = vld [vmem:[%s2116_s5] sm:$0x1]  ;;  %v1420_v49 = vld [vmem:[%s2117_s6 + $0x8] sm:$0xff]   ;;  %v1421_v51 = vld [vmem:[%s2117_s6 + $0x10] sm:$0xff]   ;;  %s2150_s8 = sld [smem:[#allocation20_spill]] }
  0xa4   : > { %v553_v7 = vld [vmem:[%s484_s13] sm:$0xff]  ;;  %v554_v8 = vld [vmem:[%s484_s13 + $0x8] sm:$0xff]  ;;  %v630_v22 = vpack.c.bf16 %v629_v18, %v629_v18  ;;  %v1422_v53 = vld [vmem:[%s2117_s6 + $0x18] sm:$0xff]   ;;  %s478_s13 = scalar_lea.vmem [#allocation11], %s1151_s25  ;;  %s999_s15 = scalar_lea.sflag [#allocation4], %s1962_s29 }
  0xa5   : > { %1238 = vmatpush3.bf16.msra.mxu0 %v1409_v2  ;;  %v555_v9 = vpack.c.bf16 %v554_v8, %v553_v7  ;;  %1252 = vmatpush3.bf16.msra.mxu1 %v1412_v11  ;;  %v610_v37 = vld [vmem:[%s2114_s3] sm:$0x1]  ;;  %v1424_v55 = vld [vmem:[%s2117_s6 + $0x28] sm:$0xff]   ;;  %v1425_v56 = vld [vmem:[%s2117_s6 + $0x30] sm:$0xff]   ;;  %s1012_s30 = sshll.u32 %s478_s13, 4  ;;  %s1676_s21 = smov [#allocation11]   ;;  %s2062_s30 = int_to_ptr.vmem [resolvable:$true] %s1012_s30 }
  0xa6   : > { %1243 = vmatprep.subr.bf16.mxu0 %v1674_v0  ;;  %1253 = vmatprep.subr.bf16.mxu1 %v1674_v0  ;;  %v632_v27 = vpack.i.b16 %v630_v22, %v630_v22  ;;  %v611_v38 = vpack.c.bf16 %v610_v37, %v610_v37  ;;  %v1419_v47 = vld [vmem:[%s2117_s6] sm:$0xff]   ;;  %v1426_v58 = vld [vmem:[%s2117_s6 + $0x38] sm:$0xff]   ;;  %v1429_v63 = vld [vmem:[#allocation10 + $0x10] sm:$0xff]   ;;  %s1589_s16 = scalar_lea.vmem %s2062_s30, 128 }
  0xa7   : > { %v1423_v54 = vld [vmem:[%s2117_s6 + $0x20] sm:$0xff]   ;;  %v1427_v61 = vld [vmem:[#allocation10] sm:$0xff]   ;;  %v1430_v1 = vld [vmem:[#allocation10 + $0x18] sm:$0xff]   ;;  %p1590_p5 = scmp.ne.s32.totalorder %s2062_s30, %s1589_s16 }
  0xa8   : > { %1240 = vmatmul.mubr.msk.bf16.vlgmr.msra.gmra.mrb[0].mxu0 %vm508_vm1, %v491_v6  ;;  %v637_v31 = vrot.slane %v632_v27, %v2006_v28  ;;  %v613_v39 = vpack.i.b16 %v611_v38, %v611_v38  ;;  %v1428_v62 = vld [vmem:[#allocation10 + $0x8] sm:$0xff]   ;;  %v1431_v2 = vld [vmem:[#allocation10 + $0x20] sm:$0xff]   ;;  %v1433_v4 = vld [vmem:[#allocation10 + $0x30] sm:$0xff]  }
  0xa9   : > { %1244 = vmatpush3.bf16.msra.mxu0 %v1410_v5  ;;  %1245 = vmatprep.mubr.msk.bf16.mxu0 %vm1675_vm0, %v1674_v0  ;;  %v1432_v3 = vld [vmem:[#allocation10 + $0x28] sm:$0xff]   ;;  %v1434_v5 = vld [vmem:[#allocation10 + $0x38] sm:$0xff]   ;;  %s2067_s10 = scalar_lea.hbm %s2150_s8, %s1197_s11  ;;  %p1591_p7 = pnand %p1590_p5, %p1910_p10 }
  0xaa   : > { %1289 = vmatprep.subr.bf16.mxu0 %v1674_v0  ;;  %1254 = vmatpush3.bf16.msra.mxu1 %v1413_v12  ;;  %v618_v41 = vrot.slane %v613_v39, %v2006_v28  ;;  %v858_v6 = vld [vmem:[%s2148_s26] sm:$0x1]  ;;  %s1593_s26 = sshll.u32 %s1676_s21, 4  ;;  %s1594_s26 = int_to_ptr.vmem [resolvable:$false] %s1593_s26 }
  0xab   : > { %1255 = vmatprep.subr.bf16.mxu1 %v1674_v0  ;;  %v859_v7 = vpack.c.bf16 %v858_v6, %v858_v6  ;;  %p1592_p12 = pneg %p1591_p7  ;;  %s1595_s25 = scalar_lea.vmem %s1594_s26, 256 }
  0xac   : > { %p1596_p1 = scmp.lt.s32.totalorder %s2062_s30, %s1594_s26  ;;  %p1597_p2 = scmp.lt.s32.totalorder %s1595_s25, %s1589_s16 }
  0xad   : > { %v861_v8 = vpack.i.b16 %v859_v7, %v859_v7 }
  0xae   : > { %1256 = vmatpush3.bf16.msra.mxu1 %v1414_v13  ;;  %p1598_p13 = por %p1597_p2, %p1596_p1 }
  0xaf   : > { %1257 = vmatprep.subr.bf16.mxu1 %v1674_v0  ;;  %v866_v11 = vrot.slane %v861_v8, %v2006_v28 }
  0xb0   : > { %1246 = vmatmul.mubr.msk.bf16.vlgmr.msra.gmra.mrb[4].mxu0 %vm564_vm2, %v555_v9  ;;  %p1599_p9 = pnand %p1598_p13, %p1592_p12 }
  0xb1   : > { %1305 = vmatprep.mubr.msk.bf16.mxu0 %vm1675_vm0, %v1674_v0  ;;  %1290 = vmatpush3.bf16.msra.mxu0 %v1427_v61 }
  0xb2   : > { %1258 = vmatpush3.bf16.msra.mxu1 %v1415_v14  ;;  %1291 = vmatprep.subr.bf16.mxu0 %v1674_v0 }
  0xb3   : > { %1259 = vmatprep.subr.bf16.mxu1 %v1674_v0 }
  0xb5   : > { %1292 = vmatpush3.bf16.msra.mxu0 %v1428_v62 }
  0xb6   : > { %1260 = vmatpush3.bf16.msra.mxu1 %v1416_v15  ;;  %1293 = vmatprep.subr.bf16.mxu0 %v1674_v0 }
  0xb7   : > { %1261 = vmatprep.subr.bf16.mxu1 %v1674_v0 }
  0xb9   : > { %1294 = vmatpush3.bf16.msra.mxu0 %v1429_v63 }
  0xba   : > { %1262 = vmatpush3.bf16.msra.mxu1 %v1417_v16  ;;  %1295 = vmatprep.subr.bf16.mxu0 %v1674_v0 }
  0xbb   : > { %1263 = vmatprep.subr.bf16.mxu1 %v1674_v0 }
  0xbd   : > { %1296 = vmatpush3.bf16.msra.mxu0 %v1430_v1 }
  0xbe   : > { %1264 = vmatpush3.bf16.msra.mxu1 %v1418_v17  ;;  %1297 = vmatprep.subr.bf16.mxu0 %v1674_v0 }
  0xbf   : > { %1269 = vmatprep.subr.bf16.mxu1 %v1674_v0 }
  0xc1   : > { %1298 = vmatpush3.bf16.msra.mxu0 %v1431_v2 }
  0xc2   : > { %1299 = vmatprep.subr.bf16.mxu0 %v1674_v0 }
  0xc5   : > { %1300 = vmatpush3.bf16.msra.mxu0 %v1432_v3 }
  0xc6   : > { %1301 = vmatprep.subr.bf16.mxu0 %v1674_v0 }
  0xc9   : > { %1302 = vmatpush3.bf16.msra.mxu0 %v1433_v4 }
  0xca   : > { %1303 = vmatprep.subr.bf16.mxu0 %v1674_v0 }
  0xcd   : > { %1304 = vmatpush3.bf16.msra.mxu0 %v1434_v5 }
 0x17b   : > { %v546_v20 = vpop.f32.mrb[0].mxu0 }
 0x17c   : > { %v1241_v21 = vpop.f32.mrb[1].mxu0 }
 0x17d   : > { %v549_v23 = vpop.f32.mrb[2].mxu0  ;;  %v1178_v21 = vld [vmem:[%s2149_s27] ss:$0 sm:$0xff] }
 0x17e   : > { %v609_v24 = vpack.c.bf16 %v549_v23, %v546_v20  ;;  %v1242_v26 = vpop.f32.mrb[3].mxu0 }
 0x180   : > { %v619_v43 = vadd.bf16 %v618_v41, %v609_v24 }
 0x182   : > { %v1159_v44 = vmul.bf16 3216621497, %v619_v43 }
 0x183   : > { %v602_v29 = vpop.f32.mrb[4].mxu0 }
 0x184   : > { %v1247_v30 = vpop.f32.mrb[5].mxu0 }
 0x185   : > { %v605_v32 = vpop.f32.mrb[6].mxu0 }
 0x186   : > { %v628_v33 = vpack.c.bf16 %v605_v32, %v602_v29  ;;  %v1248_v34 = vpop.f32.mrb[7].mxu0 }
 0x188   : > { %v638_v35 = vadd.bf16 %v637_v31, %v628_v33 }
 0x18a   : > { %v1160_v36 = vmul.bf16 3216621497, %v638_v35 }
 0x18c   : > { %1435 = vpow.bf16 %v1160_v36 }
 0x197   : > { %v1436_v40 = vpop.eup %1435 }
 0x198   : > { %v643_v42 = vadd.bf16 1065369472, %v1436_v40 }
 0x19a   : > { %1437 = vrcp.bf16 %v643_v42 }
 0x19b   : > { %1439 = vpow.bf16 %v1159_v44 }
 0x1a5   : > { %v1438_v45 = vpop.eup %1437 }
 0x1a6   : > { %v645_v46 = vmul.bf16 1065369472, %v1438_v45  ;;  %v1440_v50 = vpop.eup %1439 }
 0x1a7   : > { %v624_v52 = vadd.bf16 1065369472, %v1440_v50 }
 0x1a8   : > { %v646_v48 = vmul.bf16 %v645_v46, %v638_v35 }
 0x1a9   : > { %1441 = vrcp.bf16 %v624_v52 }
 0x1aa   : > { %1266 = vmatmul.mubr.bf16.vlgmr.msra.gmra.mrb[0].mxu1 %v646_v48 }
 0x1ab   : > { %1270 = vmatpush3.bf16.msra.mxu1 %v1419_v47  ;;  %1285 = vmatprep.mubr.msk.bf16.mxu1 %vm1675_vm0, %v1674_v0 }
 0x1ac   : > { %1271 = vmatprep.subr.bf16.mxu1 %v1674_v0 }
 0x1af   : > { %1272 = vmatpush3.bf16.msra.mxu1 %v1420_v49 }
 0x1b0   : > { %1273 = vmatprep.subr.bf16.mxu1 %v1674_v0 }
 0x1b3   : > { %1274 = vmatpush3.bf16.msra.mxu1 %v1421_v51 }
 0x1b4   : > { %1275 = vmatprep.subr.bf16.mxu1 %v1674_v0  ;;  %v1442_v57 = vpop.eup %1441 }
 0x1b5   : > { %v626_v59 = vmul.bf16 1065369472, %v1442_v57 }
 0x1b7   : > { %1276 = vmatpush3.bf16.msra.mxu1 %v1422_v53  ;;  %v627_v60 = vmul.bf16 %v626_v59, %v619_v43 }
 0x1b8   : > { %1277 = vmatprep.subr.bf16.mxu1 %v1674_v0 }
 0x1bb   : > { %1278 = vmatpush3.bf16.msra.mxu1 %v1423_v54 }
 0x1bc   : > { %1279 = vmatprep.subr.bf16.mxu1 %v1674_v0 }
 0x1bf   : > { %1280 = vmatpush3.bf16.msra.mxu1 %v1424_v55 }
 0x1c0   : > { %1281 = vmatprep.subr.bf16.mxu1 %v1674_v0 }
 0x1c3   : > { %1282 = vmatpush3.bf16.msra.mxu1 %v1425_v56 }
 0x1c4   : > { %1283 = vmatprep.subr.bf16.mxu1 %v1674_v0 }
 0x1c7   : > { %1284 = vmatpush3.bf16.msra.mxu1 %v1426_v58 }
 0x1ca   : > { %1286 = vmatmul.mubr.bf16.vlgmr.msra.gmra.mrb[0].mxu1 %v627_v60 }
 0x29d   : > { %v850_v9 = vpop.f32.mrb[0].mxu1 }
 0x29e   : > { %v1287_v10 = vpop.f32.mrb[1].mxu1 }
 0x29f   : > { %v853_v12 = vpop.f32.mrb[2].mxu1 }
 0x2a0   : > { %v857_v13 = vpack.c.bf16 %v853_v12, %v850_v9  ;;  %v1288_v14 = vpop.f32.mrb[3].mxu1 }
 0x2a2   : > { %v867_v15 = vadd.bf16 %v866_v11, %v857_v13 }
 0x2a4   : > { %v1177_v16 = vmul.bf16 3216621497, %v867_v15 }
 0x2a6   : > { %1443 = vpow.bf16 %v1177_v16 }
 0x2b1   : > { %v1444_v0 = vpop.eup %1443 }
 0x2b2   : > { %v872_v17 = vadd.bf16 1065369472, %v1444_v0 }
 0x2b4   : > { %1445 = vrcp.bf16 %v872_v17 }
 0x2bf   : > { %v1446_v18 = vpop.eup %1445 }
 0x2c0   : > { %v874_v19 = vmul.bf16 1065369472, %v1446_v18 }
 0x2c2   : > { %v875_v20 = vmul.bf16 %v874_v19, %v867_v15 }
 0x2c4   : > { %1306 = vmatmul.mubr.bf16.vlgmr.msra.gmra.mrb[8].mxu0 %v875_v20 }
 0x397   : > { %v981_v22 = vpop.f32.mrb[8].mxu0 }
 0x398   : > { %v1307_v23 = vpop.f32.mrb[9].mxu0  ;;  %v982_v25 = vadd.f32 %v1178_v21, %v981_v22 }
 0x399   : > { %v984_v24 = vpop.f32.mrb[10].mxu0 }
 0x39a   : > { %v985_v26 = vadd.f32 %v1178_v21, %v984_v24  ;;  %v1308_v27 = vpop.f32.mrb[11].mxu0 }
 0x39c   : > { %v1201_v28 = vpack.c.bf16 %v985_v26, %v982_v25 }
 0x39e   : > { %1202 = vst [vmem:[%s478_s13] sm:$0xff] %v1201_v28  }
 0x39f   : > { %1602 = shalt.err (!%p1599_p9)
}
 0x3a0   : > { %s1603_s23 = scalar_lea.hbm %s2067_s10, 128  ;;  %s1607_s13 = scalar_lea.hbm %s2150_s8, 256 }
 0x3a1   : > { %p1604_p0 = scmp.ne.s32.totalorder %s2067_s10, %s1603_s23  ;;  %p1608_p8 = scmp.lt.u32.totalorder %s2067_s10, %s2150_s8 }
 0x3a2   : > { %p1609_p6 = scmp.lt.u32.totalorder %s1607_s13, %s1603_s23  ;;  %p1611_p5 = scmp.lt.u32.totalorder %s1603_s23, %s2067_s10 }
 0x3a3   : > { %p1605_p4 = pnand %p1604_p0, %p1910_p10 }
 0x3a4   : > { %p1610_p3 = por %p1609_p6, %p1608_p8 }
 0x3a5   : > { %p1606_p11 = pneg %p1605_p4 }
 0x3a6   : > { %p1612_p7 = por %p1611_p5, %p1610_p3 }
 0x3a8   : > { %p1613_p12 = pnand %p1612_p7, %p1606_p11 }
 0x3aa   : > { %1616 = shalt.err (!%p1613_p12)
}
 0x3ab   : > { %s1677_s28 = smov 64   ;;  %s1678_s16 = smov 4  }
 0x3ac   : > { %1331 = dma.vmem_to_hbm [thread:$0]  (%p1910_p10), %s2062_s30, 128, %s2067_s10, %s999_s15, %s1677_s28, %s1677_s28, %s1678_s16  }
 0x3ad PF: > { %s2151_s21 = sld [smem:[#allocation16_spill]]  ;;  %s2152_s26 = sld [smem:[#allocation17_spill]] }
 0x3ae   : > { %p2154_p2 = scmp.ge.s32.totalorder %s1663_s20, 2 }
 0x3b3   : > { %s1027_s25 = sand.u32 1, %s2151_s21   ;;  %p2153_p1 = scmp.ne.s32.totalorder %s2152_s26, 0 }
 0x3b4   : > { %s1028_s23 = scalar_lea.sflag [#allocation4], %s1027_s25 }
 0x3b5   : > { %p1351_p13 = pnand %p2154_p2, %p2153_p1 }
 0x3b7   : > { %1646 = dma.done.wait (!%p1351_p13), %s1028_s23, 128  }
 0x3b8   : > { %1648 = vsyncadd (!%p1351_p13), %s1028_s23, 4294967168  ;;  %p26_p9 = scmp.ge.s32.totalorder %s1900_s24, 4   ;;  %s2155_s17 = smov %s1655_s18 }
 0x3b9   : > { %s2156_s18 = smov %s1659_s19  ;;  %s2157_s19 = smov %s1916_s22 }
 0x3ba   : > { %s2158_s20 = smov %s1900_s24  ;;  %28 = sbr.rel (!%p26_p9) target bundleno = 11 (0xb), region = 128 }
 0x3c1   :  { %1033 = vsyncpa [#allocation3], 1 }
 0x3c2   :  { %1035 = vsyncpa [#allocation3 + $0x1], 1 }
 0x3c3   :  { %1036 = vsyncpa [#allocation6], 1 }
 0x3c4   :  { %1037 = vsyncpa [#allocation9], 1 }
 0x3c5   :  { %1038 = vsyncpa [#allocation4], 1 }
 0x3c6   :  { %1040 = vsyncpa [#allocation4 + $0x1], 1 }

</bundles_post_ra>
